<compile_context>
chip_gen: v7x
topology: tpu7x:2x2x1
jax: 0.10.0
libtpu: 0.0.40
codegen_flags: <defaults>
</compile_context>

<pallas_src>
import jax
import jax.numpy as jnp
from jax.experimental import pallas as pl
from jax.experimental.pallas import tpu as pltpu


def _round_up(v, m):
    return ((v + m - 1) // m) * m


def polarnet_kernel(x_ref, w1_ref, b1_ref, w2_ref, b2_ref, out_ref, hid_ref):
    # x_ref: (2, TN) — batch on the lane (last) axis; lane-dense compute.
    x0 = x_ref[0:1, :]                       # (1, TN)
    x1 = x_ref[1:2, :]                       # (1, TN)

    # r = ||x||_2, a = atan2(x1, x0)
    r = jnp.sqrt(x0 * x0 + x1 * x1)          # (1, TN)
    a = jnp.arctan2(x1, x0)                  # (1, TN)

    # Layer 1: [r, a] @ W1 + b1 as two rank-1 broadcast mul-adds (VPU only).
    # w1_ref: (H, 2), b1_ref: (H, 1) -> h_pre: (H, TN)
    w1 = w1_ref[...]
    h_pre = w1[:, 0:1] * r + w1[:, 1:2] * a + b1_ref[...]
    hid = jnp.tanh(h_pre)                    # (H, TN), EUP

    # Store hid1 directly in (N, H) layout: one in-kernel XLU transpose per
    # tile instead of a full extra HBM relayout pass in the wrapper.
    hid_ref[...] = jnp.transpose(hid, (1, 0))     # (TN, H), f32 (= self.hid1)

    # Layer 2: (H -> 1) as VPU multiply + sublane reduce (no degenerate MXU).
    # w2_ref: (H, 1); b2_ref: (1, 1) scalar in SMEM.
    o_pre = jnp.sum(w2_ref[...] * hid, axis=0, keepdims=True) + b2_ref[0, 0]
    # sigmoid(z) = 0.5 * tanh(0.5 * z) + 0.5 — single EUP transcendental.
    out_ref[...] = 0.5 * jnp.tanh(0.5 * o_pre) + 0.5


def polarnet_forward(x, w1, b1, w2, b2, *, tile_n=8192):
    """x: (N, 2); w1: (2, H); b1: (1, H); w2: (H, 1); b2: (1, 1).

    Returns (output (N, 1), hid1 (N, H)) — same semantics as PolarNet.forward
    plus the stored self.hid1.
    """
    N = x.shape[0]
    H = w1.shape[1]

    # Cheap relayouts of the small, non-dominant arrays only.
    x_t = jnp.asarray(x, jnp.float32).T      # (2, N)
    w1_k = w1.T                              # (H, 2)
    b1_k = b1.reshape(H, 1)                  # (H, 1)
    w2_k = w2.reshape(H, 1)                  # (H, 1)
    b2_k = b2.reshape(1, 1)                  # (1, 1) SMEM scalar

    # Lane-tile selection: no padding, no output slicing.  Ragged tails use a
    # partial final block (OOB input lanes are garbage but never reduced
    # across lanes; OOB output lanes/rows are masked on writeback).
    if N <= 256:
        tn = N                               # single exact block
    else:
        # >=2 grid steps (both v7x TensorCores active); 128-aligned lane tile.
        tn = min(tile_n, _round_up(pl.cdiv(N, 2), 128))
    grid = (pl.cdiv(N, tn),)

    out_row, hid1 = pl.pallas_call(
        polarnet_kernel,
        out_shape=(
            jax.ShapeDtypeStruct((1, N), jnp.float32),   # output (lane-dense)
            jax.ShapeDtypeStruct((N, H), jnp.float32),   # hid1 (final layout)
        ),
        grid=grid,
        in_specs=[
            pl.BlockSpec((2, tn), lambda i: (0, i)),            # x batch tile
            pl.BlockSpec((H, 2), lambda i: (0, 0)),             # W1 (resident)
            pl.BlockSpec((H, 1), lambda i: (0, 0)),             # b1 (resident)
            pl.BlockSpec((H, 1), lambda i: (0, 0)),             # W2 (resident)
            pl.BlockSpec(memory_space=pltpu.MemorySpace.SMEM),  # b2 scalar
        ],
        out_specs=(
            pl.BlockSpec((1, tn), lambda i: (0, i)),
            pl.BlockSpec((tn, H), lambda i: (i, 0)),
        ),
        compiler_params=pltpu.CompilerParams(
            dimension_semantics=("parallel",),
            vmem_limit_bytes=32 * 1024 * 1024,
        ),
    )(x_t, w1_k, b1_k, w2_k, b2_k)

    # (1, N) -> (N, 1) is a contiguous reshape (no extra HBM pass).
    out = out_row.reshape(N, 1)
    return out, hid1


def init_params(key, num_hid):
    # PyTorch nn.Linear default init: U(-1/sqrt(fan_in), 1/sqrt(fan_in))
    k1, k2, k3, k4 = jax.random.split(key, 4)
    bound1 = 1.0 / jnp.sqrt(2.0)
    w1 = jax.random.uniform(k1, (2, num_hid), jnp.float32, -bound1, bound1)
    b1 = jax.random.uniform(k2, (1, num_hid), jnp.float32, -bound1, bound1)
    bound2 = 1.0 / jnp.sqrt(float(num_hid))
    w2 = jax.random.uniform(k3, (num_hid, 1), jnp.float32, -bound2, bound2)
    b2 = jax.random.uniform(k4, (1, 1), jnp.float32, -bound2, bound2)
    return w1, b1, w2, b2


def polarnet_ref(x, w1, b1, w2, b2):
    # Pure-JAX reference for correctness check.
    r = jnp.linalg.norm(x, axis=1, keepdims=True)
    a = jnp.arctan2(x[:, 1], x[:, 0])[:, None]
    i = jnp.concatenate([r, a], axis=1)
    hid = jnp.tanh(i @ w1 + b1)
    return jax.nn.sigmoid(hid @ w2 + b2), hid


if __name__ == "__main__":
    num_hid = 32
    batch = 300   # 2 grid steps (tn=256) + ragged final block of 44 rows

    key = jax.random.PRNGKey(0)
    kx, kp = jax.random.split(key)
    x = jax.random.normal(kx, (batch, 2), jnp.float32)
    w1, b1, w2, b2 = init_params(kp, num_hid)

    out, hid1 = polarnet_forward(x, w1, b1, w2, b2)
    out = jax.block_until_ready(out)
    hid1 = jax.block_until_ready(hid1)

    out_ref, hid_ref = polarnet_ref(x, w1, b1, w2, b2)
    assert out.shape == (batch, 1)
    assert hid1.shape == (batch, num_hid)
    assert jnp.allclose(out, out_ref, atol=2e-5, rtol=1e-4)
    assert jnp.allclose(hid1, hid_ref, atol=2e-5, rtol=1e-4)

    print("KERNEL_OK")
</pallas_src>

<mosaic_0001>
module attributes {stable_mosaic.version = 11 : i64} {
  func.func @polarnet_kernel(%arg0: i32, %arg1: memref<2x256xf32, #tpu.memory_space<vmem>>, %arg2: memref<32x2xf32, #tpu.memory_space<vmem>>, %arg3: memref<32x1xf32, #tpu.memory_space<vmem>>, %arg4: memref<32x1xf32, #tpu.memory_space<vmem>>, %arg5: memref<1x1xf32, #tpu.memory_space<smem>>, %arg6: memref<1x256xf32, #tpu.memory_space<vmem>>, %arg7: memref<256x32xf32, #tpu.memory_space<vmem>>) attributes {dimension_semantics = [#tpu.dimension_semantics<parallel>], iteration_bounds = array<i64: 2>, scalar_prefetch = 0 : i64, scratch_operands = 0 : i64, tpu.core_type = #tpu.core_type<tc>, window_params = [{transform_indices = @transform_0, window_bounds = array<i64: 2, 256>}, {pipeline_mode = #tpu.pipeline_mode<synchronous>, transform_indices = @transform_1, window_bounds = array<i64: 32, 2>}, {pipeline_mode = #tpu.pipeline_mode<synchronous>, transform_indices = @transform_2, window_bounds = array<i64: 32, 1>}, {pipeline_mode = #tpu.pipeline_mode<synchronous>, transform_indices = @transform_3, window_bounds = array<i64: 32, 1>}, {transform_indices = @transform_4, window_bounds = array<i64: 1, 1>}, {transform_indices = @transform_5, window_bounds = array<i64: 1, 256>}, {transform_indices = @transform_6, window_bounds = array<i64: 256, 32>}]} {
    %c0 = arith.constant 0 : index
    %c0_0 = arith.constant 0 : index
    %0 = vector.load %arg1[%c0, %c0_0] : memref<2x256xf32, #tpu.memory_space<vmem>>, vector<1x256xf32>
    %c1 = arith.constant 1 : index
    %c0_1 = arith.constant 0 : index
    %1 = vector.load %arg1[%c1, %c0_1] : memref<2x256xf32, #tpu.memory_space<vmem>>, vector<1x256xf32>
    %2 = arith.mulf %0, %0 : vector<1x256xf32>
    %3 = arith.mulf %1, %1 : vector<1x256xf32>
    %4 = arith.addf %2, %3 : vector<1x256xf32>
    %5 = math.sqrt %4 : vector<1x256xf32>
    %6 = math.atan2 %1, %0 : vector<1x256xf32>
    %c0_2 = arith.constant 0 : index
    %c0_3 = arith.constant 0 : index
    %7 = vector.load %arg2[%c0_2, %c0_3] : memref<32x2xf32, #tpu.memory_space<vmem>>, vector<32x2xf32>
    %8 = vector.extract_strided_slice %7 {offsets = [0, 0], sizes = [32, 1], strides = [1, 1]} : vector<32x2xf32> to vector<32x1xf32>
    %9 = vector.broadcast %8 : vector<32x1xf32> to vector<32x256xf32>
    %10 = vector.broadcast %5 : vector<1x256xf32> to vector<32x256xf32>
    %11 = arith.mulf %9, %10 : vector<32x256xf32>
    %12 = vector.extract_strided_slice %7 {offsets = [0, 1], sizes = [32, 1], strides = [1, 1]} : vector<32x2xf32> to vector<32x1xf32>
    %13 = vector.broadcast %12 : vector<32x1xf32> to vector<32x256xf32>
    %14 = vector.broadcast %6 : vector<1x256xf32> to vector<32x256xf32>
    %15 = arith.mulf %13, %14 : vector<32x256xf32>
    %16 = arith.addf %11, %15 : vector<32x256xf32>
    %c0_4 = arith.constant 0 : index
    %c0_5 = arith.constant 0 : index
    %17 = vector.load %arg3[%c0_4, %c0_5] : memref<32x1xf32, #tpu.memory_space<vmem>>, vector<32x1xf32>
    %18 = vector.broadcast %17 : vector<32x1xf32> to vector<32x256xf32>
    %19 = arith.addf %16, %18 : vector<32x256xf32>
    %20 = math.tanh %19 : vector<32x256xf32>
    %21 = tpu.transpose %20, [1, 0] : vector<32x256xf32> -> vector<256x32xf32>
    %c0_6 = arith.constant 0 : index
    %c0_7 = arith.constant 0 : index
    %22 = vector.load %arg7[%c0_6, %c0_7] : memref<256x32xf32, #tpu.memory_space<vmem>>, vector<256x32xf32>
    tpu.vector_store %arg7[%c0_6, %c0_7], %21 {strides = array<i32>} : memref<256x32xf32, #tpu.memory_space<vmem>>, vector<256x32xf32>,
    %c0_8 = arith.constant 0 : index
    %c0_9 = arith.constant 0 : index
    %23 = vector.load %arg4[%c0_8, %c0_9] : memref<32x1xf32, #tpu.memory_space<vmem>>, vector<32x1xf32>
    %24 = vector.broadcast %23 : vector<32x1xf32> to vector<32x256xf32>
    %25 = arith.mulf %24, %20 : vector<32x256xf32>
    %cst = arith.constant dense<0.000000e+00> : vector<256xf32>
    %26 = vector.multi_reduction <add>, %25, %cst [0] : vector<32x256xf32> to vector<256xf32>
    %27 = vector.shape_cast %26 : vector<256xf32> to vector<1x256xf32>
    %c0_10 = arith.constant 0 : index
    %c0_11 = arith.constant 0 : index
    %28 = memref.load %arg5[%c0_10, %c0_11] : memref<1x1xf32, #tpu.memory_space<smem>>
    %29 = vector.broadcast %28 : f32 to vector<1x256xf32>
    %30 = arith.addf %27, %29 : vector<1x256xf32>
    %cst_12 = arith.constant 5.000000e-01 : f32
    %31 = vector.broadcast %cst_12 : f32 to vector<1x256xf32>
    %32 = arith.mulf %31, %30 : vector<1x256xf32>
    %33 = math.tanh %32 : vector<1x256xf32>
    %cst_13 = arith.constant 5.000000e-01 : f32
    %34 = vector.broadcast %cst_13 : f32 to vector<1x256xf32>
    %35 = arith.mulf %34, %33 : vector<1x256xf32>
    %cst_14 = arith.constant 5.000000e-01 : f32
    %36 = vector.broadcast %cst_14 : f32 to vector<1x256xf32>
    %37 = arith.addf %35, %36 : vector<1x256xf32>
    %c0_15 = arith.constant 0 : index
    %c0_16 = arith.constant 0 : index
    %38 = vector.load %arg6[%c0_15, %c0_16] : memref<1x256xf32, #tpu.memory_space<vmem>>, vector<1x256xf32>
    tpu.vector_store %arg6[%c0_15, %c0_16], %37 {strides = array<i32>} : memref<1x256xf32, #tpu.memory_space<vmem>>, vector<1x256xf32>,
    return
  }
  func.func @transform_0(%arg0: i32) -> (i32, i32) {
    %c0_i32 = arith.constant 0 : i32
    %c0_i32_0 = arith.constant 0 : i32
    return %c0_i32, %arg0 : i32, i32
  }
  func.func @transform_1(%arg0: i32) -> (i32, i32) {
    %c0_i32 = arith.constant 0 : i32
    %c0_i32_0 = arith.constant 0 : i32
    %c0_i32_1 = arith.constant 0 : i32
    return %c0_i32, %c0_i32_0 : i32, i32
  }
  func.func @transform_2(%arg0: i32) -> (i32, i32) {
    %c0_i32 = arith.constant 0 : i32
    %c0_i32_0 = arith.constant 0 : i32
    %c0_i32_1 = arith.constant 0 : i32
    return %c0_i32, %c0_i32_0 : i32, i32
  }
  func.func @transform_3(%arg0: i32) -> (i32, i32) {
    %c0_i32 = arith.constant 0 : i32
    %c0_i32_0 = arith.constant 0 : i32
    %c0_i32_1 = arith.constant 0 : i32
    return %c0_i32, %c0_i32_0 : i32, i32
  }
  func.func @transform_4(%arg0: i32) -> (i32, i32) {
    %c0_i32 = arith.constant 0 : i32
    %c0_i32_0 = arith.constant 0 : i32
    %c0_i32_1 = arith.constant 0 : i32
    return %c0_i32, %c0_i32_0 : i32, i32
  }
  func.func @transform_5(%arg0: i32) -> (i32, i32) {
    %c0_i32 = arith.constant 0 : i32
    %c0_i32_0 = arith.constant 0 : i32
    return %c0_i32, %arg0 : i32, i32
  }
  func.func @transform_6(%arg0: i32) -> (i32, i32) {
    %c0_i32 = arith.constant 0 : i32
    %c0_i32_0 = arith.constant 0 : i32
    return %arg0, %c0_i32 : i32, i32
  }
}

</mosaic_0001>

<bundles_post_ra>
// kernel: tpu_custom_call.1
= control target key start
LH: loop header
LB: loop body
LE: loop exit
PB: predicated region body
PF: predicated region fallthrough
CT: control target
= control target key end

     0   :  { %s1786_s0 = inlined_call_operand.vmem [shape: f32[2,300], index: 0, kind: input, shape index: {}]   ;;  %s1787_s1 = inlined_call_operand.vmem [shape: f32[32,2], index: 1, kind: input, shape index: {}]   ;;  %s1788_s2 = inlined_call_operand.vmem [shape: f32[32,1], index: 2, kind: input, shape index: {}]   ;;  %s1789_s3 = inlined_call_operand.vmem [shape: f32[32,1], index: 3, kind: input, shape index: {}]   ;;  %s1790_s4 = inlined_call_operand.<no memory space> [shape: f32[1,1], index: 4, kind: input, shape index: {}]   ;;  %s1791_s5 = inlined_call_operand.hbm [shape: f32[1,300], index: 5, kind: output, shape index: {0}]   ;;  %s1792_s6 = inlined_call_operand.vmem [shape: f32[300,32], index: 6, kind: output, shape index: {1}]  }
   0x1   :  { %12 = sst [smem:[#allocation2]] %s1790_s4 }
   0x2   :  { %13 = vsyncpa [#allocation4], 0 }
   0x3   :  { %15 = vsyncpa [#allocation4 + $0x1], 0  ;;  %s1398_s23 = smov 0   ;;  %s1400_s24 = smov 0  }
   0x4   :  { %s1402_s25 = smov 0   ;;  %s1404_s26 = smov 0  }
   0x5 LB: > { %s1419_s4 = sadd.s32 4294967295, %s1320_s26   ;;  %s1053_s27 = sadd.s32 4294967294, %s1320_s26   ;;  %s1320_s26 = sphi %s1404_s26, %s1803_s26   ;;  %s1316_s25 = sphi %s1402_s25, %s1802_s25   ;;  %s1312_s24 = sphi %s1400_s24, %s1801_s24   ;;  %s1308_s23 = sphi %s1398_s23, %s1800_s23  }
   0x6   : > { %s1423_s28 = sadd.s32 1, %s1320_s26   ;;  %s138_s29 = sadd.s32 1, %s1316_s25 }
   0x7   : > { %s135_s30 = ssub.s32 %s1320_s26, %s1423_s28  ;;  %p148_p0 = scmp.ne.s32.totalorder %s1316_s25, %s1312_s24 }
   0x8   : > { %p136_p1 = scmp.eq.s32.totalorder %s135_s30, 0  ;;  %p149_p2 = scmp.eq.s32.totalorder %s1419_s4, 1 }
   0x9   : > { %p154_p3 = scmp.ne.s32.totalorder %s1312_s24, %s1308_s23  ;;  %p155_p4 = scmp.eq.s32.totalorder %s1053_s27, 1 }
   0xa   : > { %s1434_s7 = scalar_select %p136_p1, %s1316_s25, %s138_s29  }
   0xb   : > { %p1436_p5 = por %p149_p2, %p148_p0  ;;  %p1440_p6 = por %p155_p4, %p154_p3 }
   0xc   : > { %p1056_p7 = scmp.ge.s32.totalorder %s1320_s26, 1  ;;  %p228_p8 = scmp.lt.s32.totalorder %s1320_s26, 3 }
   0xe   : > { %p229_p9 = pnand %p1056_p7, %p228_p8 }
   0xf   : > { %v351_v0 = vld [vmem:[%s1787_s1 + $0x8] sm:$0xff] (!%p229_p9)  ;;  %v350_v1 = vld [vmem:[%s1787_s1] sm:$0xff] (!%p229_p9)  ;;  %s1453_s14 = sshll.u32 (!%p229_p9), %s1419_s4, 1  ;;  %v1354_v2 = vmov (!%p229_p9), 1   ;;  %v1355_v3 = vmov (!%p229_p9), 0   ;;  %v352_v4 = vld [vmem:[%s1787_s1 + $0x10] sm:$0xff] (!%p229_p9)  ;;  %v375_v54 = vlaneseq (!%p229_p9) }
  0x10   : > { %232 = sbr.rel (%p229_p9) target bundleno = 459 (0x1cb), region = 40  ;;  %1195 = vset.pattern.permute.xlu0 (!%p229_p9), %v1354_v2  ;;  %1196 = vset.pattern.permute.xlu1 (!%p229_p9), %v1355_v3  ;;  %p271_p10 = scmp.lt.s32.totalorder (!%p229_p9), %s1453_s14, 2  ;;  %v353_v9 = vld [vmem:[%s1787_s1 + $0x18] sm:$0xff] (!%p229_p9)  ;;  %v436_v10 = vld [vmem:[%s1788_s2] sm:$0xff] (!%p229_p9)  ;;  %v438_v12 = vld [vmem:[%s1788_s2 + $0x10] sm:$0xff] (!%p229_p9)  ;;  %v1356_v47 = vmov (!%p229_p9), 0.0  }
  0x11   : > { %361 = vperm.xlu1 (!%p229_p9), %1196, %v351_v0   ;;  %394 = vperm.xlu0 (!%p229_p9), %1195, %v350_v1   ;;  %v573_v13 = vld [vmem:[%s1789_s3] sm:$0xff] (!%p229_p9)  ;;  %v437_v14 = vld [vmem:[%s1788_s2 + $0x8] sm:$0xff] (!%p229_p9)  ;;  %v575_v15 = vld [vmem:[%s1789_s3 + $0x10] sm:$0xff] (!%p229_p9)  ;;  %s1505_s30 = sand.u32 (!%p229_p9), 1, %s1312_s24   ;;  %v1357_v51 = vmov (!%p229_p9), 0.7853982  }
  0x12   : > { %v439_v18 = vld [vmem:[%s1788_s2 + $0x18] sm:$0xff] (!%p229_p9)  ;;  %v574_v20 = vld [vmem:[%s1789_s3 + $0x8] sm:$0xff] (!%p229_p9)  ;;  %v1523_v57 = vshrl.u32 (!%p229_p9), %v375_v54, 7  ;;  %s623_s10 = sld [smem:[#allocation2]] (!%p229_p9)  ;;  %s1057_s11 = sshll.u32 (!%p229_p9), %s1505_s30, 1  ;;  %vm655_vm12 = vcmp.lt.s32.totalorder (!%p229_p9), %v375_v54, 256 }
  0x13   : > { %v576_v22 = vld [vmem:[%s1789_s3 + $0x18] sm:$0xff] (!%p229_p9)  ;;  %s1531_s12 = scalar_lea.vmem (!%p229_p9), [#allocation3], %s1057_s11  ;;  %s1058_s13 = sshll.u32 (!%p229_p9), %s1505_s30, 8  ;;  %vm540_vm13 = vcmask (!%p229_p9), 261120  }
  0x14   : > { %s1535_s15 = scalar_lea.vmem (!%p229_p9), [#allocation5], %s1058_s13   ;;  %s659_s16 = scalar_lea.sflag (!%p229_p9), [#allocation4], %s1505_s30 }
  0x15   : > { %1197 = vset.pattern.permute.xlu1 (!%p229_p9), %v1354_v2  ;;  %402 = vperm.xlu0 (!%p229_p9), %1195, %v352_v4  }
  0x16   : > { %398 = vperm.xlu1 (!%p229_p9), %1197, %v351_v0   ;;  %v377_v0 = vsub.s32 (!%p229_p9), 0, %v1523_v57 }
  0x17   : > { %s272_s17 = scalar_select %p271_p10, %s1453_s14, 2 }
  0x19   : > { %s1060_s18 = sshll.u32 %s272_s17, 1  ;;  %1199 = vset.pattern.permute.xlu0 %v1355_v3  ;;  %s671_s17 = ssub.s32 (%p1436_p5), 3, %s1453_s14 }
  0x1a   : > { %s274_s21 = scalar_lea.vmem %s1786_s0, %s1060_s18  ;;  %1198 = vset.pattern.permute.xlu1 %v1355_v3  ;;  %356 = vperm.xlu0 %1199, %v350_v1   ;;  %v381_v1 = vsub.s32 1, %v1523_v57  ;;  %p672_p11 = scmp.lt.s32.totalorder (%p1436_p5), %s671_s17, 2 }
  0x1b   : > { %v1463_v5 = vld [vmem:[%s274_s21] ss:$2 sm:$0x3]  ;;  %v1465_v6 = vld [vmem:[%s274_s21 + $0x1] ss:$2 sm:$0x3]  ;;  %366 = vperm.xlu1 %1198, %v352_v4  }
  0x1c   : > { %v1468_v7 = vand.u32 2147483647, %v1463_v5  ;;  %v1471_v8 = vand.u32 2147483647, %v1465_v6  ;;  %v293_v40 = vmul.f32 %v1463_v5, %v1463_v5  ;;  %v294_v41 = vmul.f32 %v1465_v6, %v1465_v6 }
  0x1d   : > { %vm330_vm1 = vcmp.lt.f32.partialorder %v1463_v5, 0.0  ;;  %vm333_vm2 = vcmp.lt.s32.totalorder %v1463_v5, 0  ;;  %vm335_vm3 = vcmp.eq.f32.partialorder %v1465_v6, 0.0  ;;  %vm337_vm4 = vcmp.ne.f32.partialorder %v1463_v5, %v1463_v5 }
  0x1e   : > { %v306_v11 = vmax.f32 %v1468_v7, %v1471_v8  ;;  %371 = vperm.xlu0 %1199, %v353_v9   ;;  %v305_v16 = vmin.f32 %v1468_v7, %v1471_v8  ;;  %vm327_vm0 = vcmp.gt.f32.partialorder %v1471_v8, %v1468_v7  ;;  %v295_v43 = vadd.f32 %v294_v41, %v293_v40 }
  0x1f   : > { %442 = vperm.xlu1 %1198, %v436_v10   ;;  %v334_v48 = vsel %vm333_vm2, 3.1415927, %v1356_v47  ;;  %vm338_vm5 = vcmp.ne.f32.partialorder %v1465_v6, %v1465_v6  ;;  %vm343_vm7 = vcmp.eq.s32.totalorder %v1468_v7, inf  ;;  %vm344_vm8 = vcmp.eq.s32.totalorder %v1471_v8, inf }
  0x20   : > { %1202 = vrcp.f32 %v306_v11  ;;  %vm339_vm6 = vmor %vm337_vm4, %vm338_vm5  ;;  %v342_v52 = vsel %vm330_vm1, 2.3561945, %v1357_v51  ;;  %vm298_vm10 = vcmp.eq.f32.partialorder %v295_v43, inf  ;;  %v348_v61 = vand.u32 2147483648, %v1465_v6 }
  0x21   : > { %1204 = vrsqrt.f32 %v295_v43  ;;  %vm345_vm9 = vmand %vm343_vm7, %vm344_vm8  ;;  %v301_v62 = vand.u32 2147483648, %v295_v43  ;;  %vm300_vm11 = vcmp.eq.f32.partialorder %v295_v43, 0.0 }
  0x22   : > { %452 = vperm.xlu0 %1199, %v438_v12  }
  0x23   : > { %1200 = vset.pattern.permute.xlu1 %v1354_v2 }
  0x24   : > { %406 = vperm.xlu1 %1200, %v353_v9  }
  0x26   : > { %579 = vperm.xlu0 %1199, %v573_v13  }
  0x28   : > { %1201 = vset.pattern.permute.xlu1 %v1355_v3 }
  0x29   : > { %447 = vperm.xlu1 %1201, %v437_v14  }
  0x2a   : > { %v1203_v17 = vpop.eup %1202  ;;  %589 = vperm.xlu0 %1199, %v575_v15  }
  0x2b   : > { %v308_v19 = vmul.f32 %v1203_v17, %v305_v16  ;;  %v1205_v53 = vpop.eup %1204 }
  0x2c   : > { %v297_v56 = vmul.f32 %v1205_v53, %v295_v43 }
  0x2d   : > { %457 = vperm.xlu1 %1201, %v439_v18   ;;  %v309_v21 = vmul.f32 %v308_v19, %v308_v19 }
  0x2e   : > { %v299_v63 = vsel %vm298_vm10, %v295_v43, %v297_v56 }
  0x2f   : > { %v310_v23 = vmul.f32 0.002785687, %v309_v21  ;;  %v302_v4 = vsel %vm300_vm11, %v301_v62, %v299_v63 }
  0x30   : > { %v378_v7 = vrot.slane %v302_v4, %v377_v0  ;;  %v382_v8 = vrot.slane %v302_v4, %v381_v1 }
  0x31   : > { %584 = vperm.xlu1 %1201, %v574_v20   ;;  %v311_v24 = vadd.f32 -0.015866, %v310_v23 }
  0x33   : > { %v312_v25 = vmul.f32 %v311_v24, %v309_v21 }
  0x35   : > { %594 = vperm.xlu1 %1201, %v576_v22   ;;  %v313_v26 = vadd.f32 0.04247222, %v312_v25 }
  0x37   : > { %v314_v27 = vmul.f32 %v313_v26, %v309_v21 }
  0x39   : > { %v315_v28 = vadd.f32 -0.074975304, %v314_v27 }
  0x3b   : > { %v316_v29 = vmul.f32 %v315_v28, %v309_v21 }
  0x3d   : > { %v317_v30 = vadd.f32 0.1064488, %v316_v29 }
  0x3f   : > { %v318_v31 = vmul.f32 %v317_v30, %v309_v21 }
  0x41   : > { %v319_v32 = vadd.f32 -0.14207031, %v318_v31 }
  0x43   : > { %v320_v33 = vmul.f32 %v319_v32, %v309_v21 }
  0x45   : > { %v321_v34 = vadd.f32 0.19993454, %v320_v33 }
  0x47   : > { %v322_v35 = vmul.f32 %v321_v34, %v309_v21 }
  0x49   : > { %v323_v36 = vadd.f32 -0.33333147, %v322_v35 }
  0x4b   : > { %v324_v37 = vmul.f32 %v323_v36, %v309_v21 }
  0x4d   : > { %v325_v38 = vmul.f32 %v324_v37, %v308_v19 }
  0x4f   : > { %v326_v39 = vadd.f32 %v325_v38, %v308_v19 }
  0x51   : > { %v328_v42 = vsub.f32 1.5707964, %v326_v39 }
  0x53   : > { %v329_v44 = vsel %vm327_vm0, %v328_v42, %v326_v39 }
  0x54   : > { %v331_v45 = vsub.f32 3.1415927, %v329_v44 }
  0x56   : > { %v332_v46 = vsel %vm330_vm1, %v331_v45, %v329_v44 }
  0x57   : > { %v336_v49 = vsel %vm335_vm3, %v334_v48, %v332_v46 }
  0x58   : > { %v340_v50 = vsel %vm339_vm6, nan, %v336_v49 }
  0x59   : > { %v346_v55 = vsel %vm345_vm9, %v342_v52, %v340_v50 }
  0x5a   : > { %v347_v60 = vand.u32 2147483647, %v346_v55 }
  0x5c   : > { %v349_v2 = vor.u32 %v348_v61, %v347_v60 }
  0x5e   : > { %v413_v9 = vrot.slane %v349_v2, %v377_v0  ;;  %v417_v10 = vrot.slane %v349_v2, %v381_v1 }
  0x90   : > { %v362_v58 = vpop.permute.xlu1 %361  ;;  %v395_v59 = vpop.permute.xlu0 %394 }
  0x91   : > { %v420_v12 = vmul.f32 %v413_v9, %v395_v59  ;;  %v421_v13 = vmul.f32 %v417_v10, %v395_v59  ;;  %v387_v32 = vmul.f32 %v378_v7, %v362_v58  ;;  %v388_v33 = vmul.f32 %v382_v8, %v362_v58 }
  0x94   : > { %v403_v3 = vpop.permute.xlu0 %402 }
  0x95   : > { %v399_v5 = vpop.permute.xlu1 %398  ;;  %v424_v24 = vmul.f32 %v413_v9, %v403_v3  ;;  %v425_v25 = vmul.f32 %v417_v10, %v403_v3 }
  0x96   : > { %v422_v27 = vmul.f32 %v413_v9, %v399_v5  ;;  %v423_v28 = vmul.f32 %v417_v10, %v399_v5 }
  0x98   : > { %v430_v38 = vadd.f32 %v422_v27, %v387_v32  ;;  %v431_v39 = vadd.f32 %v423_v28, %v388_v33 }
  0x99   : > { %v357_v11 = vpop.permute.xlu0 %356 }
  0x9a   : > { %v385_v14 = vmul.f32 %v378_v7, %v357_v11  ;;  %v386_v6 = vmul.f32 %v382_v8, %v357_v11  ;;  %v367_v15 = vpop.permute.xlu1 %366 }
  0x9b   : > { %v389_v20 = vmul.f32 %v378_v7, %v367_v15  ;;  %v390_v23 = vmul.f32 %v382_v8, %v367_v15 }
  0x9c   : > { %v428_v16 = vadd.f32 %v420_v12, %v385_v14  ;;  %v429_v17 = vadd.f32 %v421_v13, %v386_v6 }
  0x9d   : > { %v372_v18 = vpop.permute.xlu0 %371  ;;  %v432_v29 = vadd.f32 %v424_v24, %v389_v20  ;;  %v433_v31 = vadd.f32 %v425_v25, %v390_v23  ;;  %v624_v23 = vstv %s623_s10 }
  0x9e   : > { %v443_v19 = vpop.permute.xlu1 %442  ;;  %v391_v40 = vmul.f32 %v378_v7, %v372_v18  ;;  %v392_v42 = vmul.f32 %v382_v8, %v372_v18 }
  0x9f   : > { %v460_v21 = vadd.f32 %v443_v19, %v428_v16  ;;  %v461_v22 = vadd.f32 %v443_v19, %v429_v17 }
  0xa1   : > { %1206 = vtanh.f32 %v460_v21  ;;  %v453_v26 = vpop.permute.xlu0 %452 }
  0xa2   : > { %1208 = vtanh.f32 %v461_v22  ;;  %v464_v34 = vadd.f32 %v453_v26, %v432_v29  ;;  %v465_v35 = vadd.f32 %v453_v26, %v433_v31  ;;  %v1358_v31 = vmov 1966171168  }
  0xa3   : > { %v407_v30 = vpop.permute.xlu1 %406  ;;  %v639_v32 = vunpack.c.l.s4 %v1358_v31 }
  0xa4   : > { %v426_v36 = vmul.f32 %v413_v9, %v407_v30  ;;  %v427_v37 = vmul.f32 %v417_v10, %v407_v30  ;;  %1210 = vtanh.f32 %v464_v34 }
  0xa5   : > { %1212 = vtanh.f32 %v465_v35  ;;  %v580_v52 = vpop.permute.xlu0 %579  ;;  %v640_v34 = vunpack.c.0.s8 %v639_v32 }
  0xa6   : > { %v434_v46 = vadd.f32 %v426_v36, %v391_v40  ;;  %v435_v47 = vadd.f32 %v427_v37, %v392_v42 }
  0xa8   : > { %v448_v41 = vpop.permute.xlu1 %447 }
  0xa9   : > { %v462_v43 = vadd.f32 %v448_v41, %v430_v38  ;;  %v463_v44 = vadd.f32 %v448_v41, %v431_v39  ;;  %v590_v63 = vpop.permute.xlu0 %589  ;;  %v643_v39 = vsub.s32 %v640_v34, %v1523_v57 }
  0xab   : > { %v1207_v45 = vpop.eup %1206  ;;  %1214 = vtanh.f32 %v462_v43 }
  0xac   : > { %v1209_v48 = vpop.eup %1208  ;;  %1216 = vtanh.f32 %v463_v44  ;;  %v458_v49 = vpop.permute.xlu1 %457  ;;  %476 = vxpose.xlu0.b32.start [1/4] (short) %v1207_v45, 128  ;;  %v597_v60 = vmul.f32 %v1207_v45, %v580_v52 }
  0xad   : > { %v466_v50 = vadd.f32 %v458_v49, %v434_v46  ;;  %v467_v51 = vadd.f32 %v458_v49, %v435_v47  ;;  %508 = vxpose.xlu1.b32.start [1/4] (short) %v1209_v48, 128  ;;  %v598_v62 = vmul.f32 %v1209_v48, %v580_v52 }
  0xae   : > { %v1211_v53 = vpop.eup %1210 }
  0xaf   : > { %1218 = vtanh.f32 %v466_v50  ;;  %v1213_v56 = vpop.eup %1212  ;;  %v601_v1 = vmul.f32 %v1211_v53, %v590_v63 }
  0xb0   : > { %1220 = vtanh.f32 %v467_v51  ;;  %v585_v55 = vpop.permute.xlu1 %584  ;;  %v602_v4 = vmul.f32 %v1213_v56, %v590_v63 }
  0xb4   : > { %v595_v7 = vpop.permute.xlu1 %594 }
  0xb5   : > { %v1215_v58 = vpop.eup %1214 }
  0xb6   : > { %v1217_v59 = vpop.eup %1216  ;;  %v599_v61 = vmul.f32 %v1215_v58, %v585_v55  ;;  %477 = vxpose.xlu0.b32.cont [2/4] (short) %v1215_v58, 128 }
  0xb7   : > { %v600_v0 = vmul.f32 %v1217_v59, %v585_v55  ;;  %509 = vxpose.xlu1.b32.cont [2/4] (short) %v1217_v59, 128 }
  0xb8   : > { %v605_v2 = vadd.f32 %v599_v61, %v597_v60 }
  0xb9   : > { %v1219_v3 = vpop.eup %1218  ;;  %v614_v5 = vadd.f32 %v600_v0, %v598_v62 }
  0xba   : > { %v1221_v8 = vpop.eup %1220  ;;  %v603_v9 = vmul.f32 %v1219_v3, %v595_v7  ;;  %v606_v10 = vadd.f32 %v605_v2, %v601_v1  ;;  %478 = vxpose.xlu0.b32.cont [3/4] (short) %v1211_v53, 128 }
  0xbb   : > { %v604_v11 = vmul.f32 %v1221_v8, %v595_v7  ;;  %v615_v12 = vadd.f32 %v614_v5, %v602_v4  ;;  %510 = vxpose.xlu1.b32.cont [3/4] (short) %v1213_v56, 128 }
  0xbc   : > { %v607_v13 = vadd.f32 %v606_v10, %v603_v9 }
  0xbd   : > { %v616_v14 = vadd.f32 %v615_v12, %v604_v11 }
  0xbe   : > { %v608_v6 = vrot.slane %v607_v13, 4  ;;  %479 = vxpose.xlu0.b32.end [4/4] (short) %v1219_v3, 128 }
  0xbf   : > { %v617_v15 = vrot.slane %v616_v14, 4  ;;  %511 = vxpose.xlu1.b32.end [4/4] (short) %v1221_v8, 128 }
  0xc0   : > { %v609_v16 = vadd.f32 %v608_v6, %v607_v13 }
  0xc1   : > { %v618_v17 = vadd.f32 %v617_v15, %v616_v14 }
  0xc2   : > { %v610_v18 = vrot.slane %v609_v16, 2 }
  0xc3   : > { %v619_v19 = vrot.slane %v618_v17, 2 }
  0xc4   : > { %v611_v20 = vadd.f32 %v610_v18, %v609_v16 }
  0xc5   : > { %v620_v21 = vadd.f32 %v619_v19, %v618_v17 }
  0xc6   : > { %v612_v22 = vrot.slane %v611_v20, 1 }
  0xc7   : > { %v621_v24 = vrot.slane %v620_v21, 1 }
  0xc8   : > { %v613_v25 = vadd.f32 %v612_v22, %v611_v20 }
  0xc9   : > { %v622_v26 = vadd.f32 %v621_v24, %v620_v21 }
  0xca   : > { %v625_v27 = vadd.f32 %v624_v23, %v613_v25 }
  0xcb   : > { %v626_v28 = vadd.f32 %v624_v23, %v622_v26 }
  0xcc   : > { %v627_v29 = vmul.f32 0.5, %v625_v27 }
  0xcd   : > { %v628_v30 = vmul.f32 0.5, %v626_v28 }
  0xce   : > { %1222 = vtanh.f32 %v627_v29 }
  0xcf   : > { %1224 = vtanh.f32 %v628_v30 }
  0xd8   : > { %v1223_v33 = vpop.eup %1222 }
  0xd9   : > { %v1225_v35 = vpop.eup %1224  ;;  %v631_v36 = vmul.f32 0.5, %v1223_v33 }
  0xda   : > { %v632_v37 = vmul.f32 0.5, %v1225_v35 }
  0xdb   : > { %v633_v38 = vadd.f32 0.5, %v631_v36 }
  0xdc   : > { %v634_v40 = vadd.f32 0.5, %v632_v37 }
  0xde   : > { %v637_v41 = vcombine.low %v633_v38, %v634_v40 }
  0xe0   : > { %v644_v42 = vrot.slane %v637_v41, %v643_v39 }
  0xe2   : > { %v651_v43 = vrot.slane %v644_v42, %v643_v39 }
  0xe4   : > { %657 = vst.msk [vmem:[%s1531_s12] sm:$0x3] %vm655_vm12, %v651_v43 }
 0x132   : > { %v492_v44 = vpop.trf.xlu0 }
 0x133   : > { %v524_v45 = vpop.trf.xlu1  ;;  %541 = vst.msk [vmem:[%s1535_s15] sm:$0xff] %vm540_vm13, %v492_v44 }
 0x134   : > { %557 = vst.msk [vmem:[%s1535_s15 + $0x80] sm:$0xff] %vm540_vm13, %v524_v45 }
 0x136   : > { %v493_v54 = vpop.trf.xlu0 }
 0x137   : > { %v525_v57 = vpop.trf.xlu1  ;;  %542 = vst.msk [vmem:[%s1535_s15 + $0x8] sm:$0xff] %vm540_vm13, %v493_v54 }
 0x138   : > { %558 = vst.msk [vmem:[%s1535_s15 + $0x88] sm:$0xff] %vm540_vm13, %v525_v57 }
 0x13a   : > { %v494_v46 = vpop.trf.xlu0 }
 0x13b   : > { %v526_v47 = vpop.trf.xlu1  ;;  %543 = vst.msk [vmem:[%s1535_s15 + $0x10] sm:$0xff] %vm540_vm13, %v494_v46 }
 0x13c   : > { %559 = vst.msk [vmem:[%s1535_s15 + $0x90] sm:$0xff] %vm540_vm13, %v526_v47 }
 0x13e   : > { %v495_v48 = vpop.trf.xlu0 }
 0x13f   : > { %v527_v49 = vpop.trf.xlu1  ;;  %544 = vst.msk [vmem:[%s1535_s15 + $0x18] sm:$0xff] %vm540_vm13, %v495_v48 }
 0x140   : > { %560 = vst.msk [vmem:[%s1535_s15 + $0x98] sm:$0xff] %vm540_vm13, %v527_v49 }
 0x142   : > { %v496_v50 = vpop.trf.xlu0 }
 0x143   : > { %v528_v51 = vpop.trf.xlu1  ;;  %545 = vst.msk [vmem:[%s1535_s15 + $0x20] sm:$0xff] %vm540_vm13, %v496_v50 }
 0x144   : > { %561 = vst.msk [vmem:[%s1535_s15 + $0xa0] sm:$0xff] %vm540_vm13, %v528_v51 }
 0x146   : > { %v497_v52 = vpop.trf.xlu0 }
 0x147   : > { %v529_v53 = vpop.trf.xlu1  ;;  %546 = vst.msk [vmem:[%s1535_s15 + $0x28] sm:$0xff] %vm540_vm13, %v497_v52 }
 0x148   : > { %562 = vst.msk [vmem:[%s1535_s15 + $0xa8] sm:$0xff] %vm540_vm13, %v529_v53 }
 0x14a   : > { %v498_v55 = vpop.trf.xlu0 }
 0x14b   : > { %v530_v56 = vpop.trf.xlu1  ;;  %547 = vst.msk [vmem:[%s1535_s15 + $0x30] sm:$0xff] %vm540_vm13, %v498_v55 }
 0x14c   : > { %563 = vst.msk [vmem:[%s1535_s15 + $0xb0] sm:$0xff] %vm540_vm13, %v530_v56 }
 0x14e   : > { %v499_v58 = vpop.trf.xlu0 }
 0x14f   : > { %v531_v59 = vpop.trf.xlu1  ;;  %548 = vst.msk [vmem:[%s1535_s15 + $0x38] sm:$0xff] %vm540_vm13, %v499_v58 }
 0x150   : > { %564 = vst.msk [vmem:[%s1535_s15 + $0xb8] sm:$0xff] %vm540_vm13, %v531_v59 }
 0x152   : > { %v500_v60 = vpop.trf.xlu0 }
 0x153   : > { %v532_v61 = vpop.trf.xlu1  ;;  %549 = vst.msk [vmem:[%s1535_s15 + $0x40] sm:$0xff] %vm540_vm13, %v500_v60 }
 0x154   : > { %565 = vst.msk [vmem:[%s1535_s15 + $0xc0] sm:$0xff] %vm540_vm13, %v532_v61 }
 0x156   : > { %v501_v62 = vpop.trf.xlu0 }
 0x157   : > { %v533_v63 = vpop.trf.xlu1  ;;  %550 = vst.msk [vmem:[%s1535_s15 + $0x48] sm:$0xff] %vm540_vm13, %v501_v62 }
 0x158   : > { %566 = vst.msk [vmem:[%s1535_s15 + $0xc8] sm:$0xff] %vm540_vm13, %v533_v63 }
 0x15a   : > { %v502_v0 = vpop.trf.xlu0 }
 0x15b   : > { %v534_v1 = vpop.trf.xlu1  ;;  %551 = vst.msk [vmem:[%s1535_s15 + $0x50] sm:$0xff] %vm540_vm13, %v502_v0 }
 0x15c   : > { %567 = vst.msk [vmem:[%s1535_s15 + $0xd0] sm:$0xff] %vm540_vm13, %v534_v1 }
 0x15e   : > { %v503_v2 = vpop.trf.xlu0 }
 0x15f   : > { %v535_v3 = vpop.trf.xlu1  ;;  %552 = vst.msk [vmem:[%s1535_s15 + $0x58] sm:$0xff] %vm540_vm13, %v503_v2 }
 0x160   : > { %568 = vst.msk [vmem:[%s1535_s15 + $0xd8] sm:$0xff] %vm540_vm13, %v535_v3 }
 0x162   : > { %v504_v4 = vpop.trf.xlu0 }
 0x163   : > { %v536_v5 = vpop.trf.xlu1  ;;  %553 = vst.msk [vmem:[%s1535_s15 + $0x60] sm:$0xff] %vm540_vm13, %v504_v4 }
 0x164   : > { %569 = vst.msk [vmem:[%s1535_s15 + $0xe0] sm:$0xff] %vm540_vm13, %v536_v5 }
 0x166   : > { %v505_v7 = vpop.trf.xlu0 }
 0x167   : > { %v537_v8 = vpop.trf.xlu1  ;;  %554 = vst.msk [vmem:[%s1535_s15 + $0x68] sm:$0xff] %vm540_vm13, %v505_v7 }
 0x168   : > { %570 = vst.msk [vmem:[%s1535_s15 + $0xe8] sm:$0xff] %vm540_vm13, %v537_v8 }
 0x16a   : > { %v506_v9 = vpop.trf.xlu0  ;;  %669 = sbr.rel (!%p1436_p5) target bundleno = 396 (0x18c), region = 44 }
 0x16b   : > { %v538_v10 = vpop.trf.xlu1  ;;  %555 = vst.msk [vmem:[%s1535_s15 + $0x70] sm:$0xff] %vm540_vm13, %v506_v9 }
 0x16c   : > { %571 = vst.msk [vmem:[%s1535_s15 + $0xf0] sm:$0xff] %vm540_vm13, %v538_v10 }
 0x16e   : > { %v507_v11 = vpop.trf.xlu0 }
 0x16f   : > { %v539_v12 = vpop.trf.xlu1  ;;  %556 = vst.msk [vmem:[%s1535_s15 + $0x78] sm:$0xff] %vm540_vm13, %v507_v11 }
 0x170   : > { %572 = vst.msk [vmem:[%s1535_s15 + $0xf8] sm:$0xff] %vm540_vm13, %v539_v12 }
 0x171   : > { %s1805_s17 = smov (!%p672_p11, %s671_s17), 2 }
 0x172   : > { %s1605_s18 = sshll.u32 %s1805_s17, 4 }
 0x173   : > { %s676_s19 = ssub.s32 32, %s1605_s18 }
 0x174   : > { %677 = vsyncadd %s659_s16, %s676_s19  ;;  %p1066_p12 = scmp.ne.s32.totalorder %s1605_s18, 0  ;;  %s1084_s20 = sshll.u32 %s1419_s4, 5 }
 0x175   : > { %s1615_s27 = scalar_lea.hbm %s1791_s5, %s1084_s20  ;;  %s682_s14 = sshll.u32 %s1531_s12, 4  ;;  %s683_s14 = int_to_ptr.vmem [resolvable:$true] %s682_s14 }
 0x176   : > { %s1226_s29 = scalar_lea.vmem %s683_s14, %s1605_s18  ;;  %s1359_s10 = smov [#allocation3]  }
 0x177   : > { %p1227_p13 = scmp.ne.s32.totalorder %s683_s14, %s1226_s29  ;;  %s1230_s11 = sshll.u32 %s1359_s10, 4  ;;  %s1231_s11 = int_to_ptr.vmem [resolvable:$false] %s1230_s11 }
 0x178   : > { %s1232_s13 = scalar_lea.vmem %s1231_s11, 64  ;;  %p1233_p2 = scmp.lt.s32.totalorder %s683_s14, %s1231_s11 }
 0x179   : > { %p1228_p0 = pnand %p1227_p13, %p1066_p12  ;;  %p1234_p3 = scmp.lt.s32.totalorder %s1232_s13, %s1226_s29 }
 0x17b   : > { %p1229_p1 = pneg %p1228_p0  ;;  %p1235_p4 = por %p1234_p3, %p1233_p2 }
 0x17d   : > { %p1236_p7 = pnand %p1235_p4, %p1229_p1 }
 0x17f   : > { %1239 = shalt.err (!%p1236_p7)
}
 0x180   : > { %s1240_s12 = scalar_lea.hbm %s1615_s27, %s1605_s18  ;;  %s1244_s20 = scalar_lea.hbm %s1791_s5, 48 }
 0x181   : > { %p1241_p8 = scmp.ne.s32.totalorder %s1615_s27, %s1240_s12  ;;  %p1245_p11 = scmp.lt.u32.totalorder %s1615_s27, %s1791_s5 }
 0x182   : > { %p1246_p13 = scmp.lt.u32.totalorder %s1244_s20, %s1240_s12  ;;  %p1248_p1 = scmp.lt.u32.totalorder %s1240_s12, %s1615_s27 }
 0x183   : > { %p1242_p9 = pnand %p1241_p8, %p1066_p12 }
 0x184   : > { %p1247_p0 = por %p1246_p13, %p1245_p11 }
 0x185   : > { %p1243_p10 = pneg %p1242_p9 }
 0x186   : > { %p1249_p2 = por %p1248_p1, %p1247_p0 }
 0x188   : > { %p1250_p3 = pnand %p1249_p2, %p1243_p10 }
 0x18a   : > { %1253 = shalt.err (!%p1250_p3)
}
 0x18b   : > { %685 = dma.vmem_to_hbm [thread:$0]  (%p1066_p12), %s683_s14, %s1605_s18, %s1615_s27, %s659_s16  }
 0x18c PF: > { %688 = sbr.rel (!%p1436_p5) target bundleno = 459 (0x1cb), region = 48  ;;  %s1068_s29 = sshll.u32 (%p1436_p5), %s1419_s4, 5 }
 0x18d   : > { %s1085_s10 = sshll.u32 (%p1436_p5), %s1419_s4, 8  ;;  %s690_s11 = ssub.s32 (%p1436_p5), 38, %s1068_s29 }
 0x18e   : > { %s1647_s17 = scalar_lea.vmem (%p1436_p5), %s1792_s6, %s1085_s10   ;;  %p691_p4 = scmp.lt.s32.totalorder (%p1436_p5), %s690_s11, 32 }
 0x193   : > { %s1807_s11 = smov (!%p691_p4, %s690_s11), 32 }
 0x194   : > { %s1069_s30 = sshll.u32 %s1807_s11, 7 }
 0x195   : > { %p1072_p12 = scmp.eq.s32.totalorder %s1069_s30, 0 }
 0x196   : > { %s1653_s8 = sshrl.u32 (!%p1072_p12), %s1807_s11, 5 }
 0x197   : > { %699 = sbr.rel (%p1072_p12) target bundleno = 459 (0x1cb), region = 52  ;;  %p1073_p5 = scmp.le.s32.totalorder (!%p1072_p12), %s1653_s8, 0 }
 0x19e   : > { %1000 = sbr.rel (%p1073_p5) target bundleno = 438 (0x1b6), region = 142  ;;  %s1795_s4 = smov (!%p1073_p5), %s1647_s17 }
 0x19f   : > { %s1796_s16 = smov (!%p1073_p5), %s1535_s15  ;;  %s1662_s18 = smov (!%p1073_p5), 0  }
 0x1a0   : > { %s1664_s27 = smov (!%p1073_p5), 0  }
 0x1a5 LB: >> { %v823_v13 = vld [vmem:[%s1328_s16] sm:$0xff]  ;;  %v825_v14 = vld [vmem:[%s1328_s16 + $0x8] sm:$0xff]  ;;  %v827_v6 = vld [vmem:[%s1328_s16 + $0x10] sm:$0xff]  ;;  %s887_s14 = sadd.s32 1, %s1332_s18  ;;  %s817_s27 = sadd.s32 1, %s1336_s27   ;;  %s1336_s27 = sphi %s1664_s27, %s817_s27   ;;  %s1332_s18 = sphi %s1662_s18, %s1799_s18   ;;  %s1328_s16 = sphi %s1796_s16, %s1798_s16   ;;  %s1324_s4 = sphi %s1795_s4, %s1797_s4  }
 0x1a6   : >> { %824 = vst [vmem:[%s1324_s4] sm:$0xff] %v823_v13  ;;  %826 = vst [vmem:[%s1324_s4 + $0x8] sm:$0xff] %v825_v14  ;;  %v829_v15 = vld [vmem:[%s1328_s16 + $0x18] sm:$0xff]  ;;  %v831_v16 = vld [vmem:[%s1328_s16 + $0x20] sm:$0xff]  ;;  %p888_p7 = scmp.ge.s32.totalorder %s887_s14, %s1653_s8  ;;  %p816_p8 = scmp.ge.s32.totalorder %s817_s27, %s1653_s8 }
 0x1a7   : >> { %828 = vst [vmem:[%s1324_s4 + $0x10] sm:$0xff] %v827_v6  ;;  %v833_v17 = vld [vmem:[%s1328_s16 + $0x28] sm:$0xff]  ;;  %830 = vst [vmem:[%s1324_s4 + $0x18] sm:$0xff] %v829_v15  ;;  %v835_v18 = vld [vmem:[%s1328_s16 + $0x30] sm:$0xff] }
 0x1a8   : >> { %832 = vst [vmem:[%s1324_s4 + $0x20] sm:$0xff] %v831_v16  ;;  %834 = vst [vmem:[%s1324_s4 + $0x28] sm:$0xff] %v833_v17  ;;  %v837_v19 = vld [vmem:[%s1328_s16 + $0x38] sm:$0xff]  ;;  %v839_v20 = vld [vmem:[%s1328_s16 + $0x40] sm:$0xff]  ;;  %s1809_s14 = smov (%p888_p7, %s887_s14), 0 }
 0x1a9   : >> { %836 = vst [vmem:[%s1324_s4 + $0x30] sm:$0xff] %v835_v18  ;;  %838 = vst [vmem:[%s1324_s4 + $0x38] sm:$0xff] %v837_v19  ;;  %v841_v21 = vld [vmem:[%s1328_s16 + $0x48] sm:$0xff]  ;;  %v843_v22 = vld [vmem:[%s1328_s16 + $0x50] sm:$0xff]  ;;  %s1074_s19 = sshll.u32 %s1809_s14, 8  ;;  %s1799_s18 = smov %s1809_s14 }
 0x1aa   : >> { %840 = vst [vmem:[%s1324_s4 + $0x40] sm:$0xff] %v839_v20  ;;  %v845_v23 = vld [vmem:[%s1328_s16 + $0x58] sm:$0xff]  ;;  %842 = vst [vmem:[%s1324_s4 + $0x48] sm:$0xff] %v841_v21  ;;  %v847_v24 = vld [vmem:[%s1328_s16 + $0x60] sm:$0xff]  ;;  %s1720_s20 = scalar_lea.vmem %s1535_s15, %s1074_s19 [#allocation5]   ;;  %s893_s21 = scalar_lea.vmem %s1647_s17, %s1074_s19  }
 0x1ab   : >> { %844 = vst [vmem:[%s1324_s4 + $0x50] sm:$0xff] %v843_v22  ;;  %846 = vst [vmem:[%s1324_s4 + $0x58] sm:$0xff] %v845_v23  ;;  %v849_v25 = vld [vmem:[%s1328_s16 + $0x68] sm:$0xff]  ;;  %v851_v26 = vld [vmem:[%s1328_s16 + $0x70] sm:$0xff] }
 0x1ac   : >> { %848 = vst [vmem:[%s1324_s4 + $0x60] sm:$0xff] %v847_v24  ;;  %850 = vst [vmem:[%s1324_s4 + $0x68] sm:$0xff] %v849_v25  ;;  %v853_v27 = vld [vmem:[%s1328_s16 + $0x78] sm:$0xff]  ;;  %v855_v28 = vld [vmem:[%s1328_s16 + $0x80] sm:$0xff] }
 0x1ad   : >> { %852 = vst [vmem:[%s1324_s4 + $0x70] sm:$0xff] %v851_v26  ;;  %v857_v29 = vld [vmem:[%s1328_s16 + $0x88] sm:$0xff]  ;;  %854 = vst [vmem:[%s1324_s4 + $0x78] sm:$0xff] %v853_v27  ;;  %v859_v30 = vld [vmem:[%s1328_s16 + $0x90] sm:$0xff] }
 0x1ae   : >> { %856 = vst [vmem:[%s1324_s4 + $0x80] sm:$0xff] %v855_v28  ;;  %858 = vst [vmem:[%s1324_s4 + $0x88] sm:$0xff] %v857_v29  ;;  %v861_v31 = vld [vmem:[%s1328_s16 + $0x98] sm:$0xff]  ;;  %v863_v32 = vld [vmem:[%s1328_s16 + $0xa0] sm:$0xff] }
 0x1af   : >> { %860 = vst [vmem:[%s1324_s4 + $0x90] sm:$0xff] %v859_v30  ;;  %862 = vst [vmem:[%s1324_s4 + $0x98] sm:$0xff] %v861_v31  ;;  %v865_v33 = vld [vmem:[%s1328_s16 + $0xa8] sm:$0xff]  ;;  %v867_v34 = vld [vmem:[%s1328_s16 + $0xb0] sm:$0xff]  ;;  %819 = sbr.rel (!%p816_p8) target bundleno = 421 (0x1a5), region = 148 }
 0x1b0   : >> { %864 = vst [vmem:[%s1324_s4 + $0xa0] sm:$0xff] %v863_v32  ;;  %v869_v35 = vld [vmem:[%s1328_s16 + $0xb8] sm:$0xff]  ;;  %866 = vst [vmem:[%s1324_s4 + $0xa8] sm:$0xff] %v865_v33  ;;  %v871_v36 = vld [vmem:[%s1328_s16 + $0xc0] sm:$0xff] }
 0x1b1   : >> { %868 = vst [vmem:[%s1324_s4 + $0xb0] sm:$0xff] %v867_v34  ;;  %870 = vst [vmem:[%s1324_s4 + $0xb8] sm:$0xff] %v869_v35  ;;  %v873_v37 = vld [vmem:[%s1328_s16 + $0xc8] sm:$0xff]  ;;  %v875_v38 = vld [vmem:[%s1328_s16 + $0xd0] sm:$0xff] }
 0x1b2   : >> { %872 = vst [vmem:[%s1324_s4 + $0xc0] sm:$0xff] %v871_v36  ;;  %874 = vst [vmem:[%s1324_s4 + $0xc8] sm:$0xff] %v873_v37  ;;  %v877_v39 = vld [vmem:[%s1328_s16 + $0xd8] sm:$0xff]  ;;  %v879_v40 = vld [vmem:[%s1328_s16 + $0xe0] sm:$0xff] }
 0x1b3   : >> { %876 = vst [vmem:[%s1324_s4 + $0xd0] sm:$0xff] %v875_v38  ;;  %v881_v41 = vld [vmem:[%s1328_s16 + $0xe8] sm:$0xff]  ;;  %878 = vst [vmem:[%s1324_s4 + $0xd8] sm:$0xff] %v877_v39  ;;  %v883_v42 = vld [vmem:[%s1328_s16 + $0xf0] sm:$0xff] }
 0x1b4   : >> { %880 = vst [vmem:[%s1324_s4 + $0xe0] sm:$0xff] %v879_v40  ;;  %882 = vst [vmem:[%s1324_s4 + $0xe8] sm:$0xff] %v881_v41  ;;  %v885_v43 = vld [vmem:[%s1328_s16 + $0xf8] sm:$0xff]  ;;  %s1798_s16 = smov %s1720_s20 }
 0x1b5   : >> { %884 = vst [vmem:[%s1324_s4 + $0xf0] sm:$0xff] %v883_v42  ;;  %886 = vst [vmem:[%s1324_s4 + $0xf8] sm:$0xff] %v885_v43  ;;  %s1797_s4 = smov %s893_s21 }
 0x1b6 PF: > { %s1761_s22 = sand.u32 31, %s1807_s11   ;;  %s1086_s29 = sshll.u32 %s1653_s8, 8 }
 0x1b7   : > { %s898_s10 = scalar_lea.vmem %s1535_s15, %s1086_s29 [#allocation5]   ;;  %s900_s13 = scalar_lea.vmem %s1647_s17, %s1086_s29  }
 0x1b8   : > { %p1079_p9 = scmp.le.s32.totalorder %s1761_s22, 0 }
 0x1b9   : > { %s1338_s12 = smov (!%p1079_p9), %s900_s13   ;;  %s1342_s30 = smov (!%p1079_p9), %s898_s10  }
 0x1ba   : > { %1014 = sbr.rel (%p1079_p9) target bundleno = 459 (0x1cb), region = 153  ;;  %s1346_s19 = smov (!%p1079_p9), 0  }
 0x1bb   : > { %s1350_s14 = smov (!%p1079_p9), 0  }
 0x1c1 LB: >> { %v910_v44 = vld [vmem:[%s1344_s30] sm:$0xff]  ;;  %s912_s11 = sadd.s32 1, %s1348_s19  ;;  %s904_s14 = sadd.s32 1, %s1352_s14   ;;  %s1352_s14 = sphi %s1350_s14, %s904_s14   ;;  %s1348_s19 = sphi %s1346_s19, %s1347_s19   ;;  %s1344_s30 = sphi %s1342_s30, %s917_s30   ;;  %s1340_s12 = sphi %s1338_s12, %s918_s12  }
 0x1c2   : >> { %911 = vst [vmem:[%s1340_s12] sm:$0xff] %v910_v44  ;;  %p913_p10 = scmp.ge.s32.totalorder %s912_s11, %s1761_s22  ;;  %p903_p11 = scmp.ge.s32.totalorder %s904_s14, %s1761_s22 }
 0x1c4   : >> { %s1811_s11 = smov (%p913_p10, %s912_s11), 0  ;;  %906 = sbr.rel (!%p903_p11) target bundleno = 449 (0x1c1), region = 159 }
 0x1c5   : >> { %s1080_s15 = sshll.u32 %s1811_s11, 3  ;;  %s1347_s19 = smov %s1811_s11  }
 0x1c6   : >> { %s917_s30 = scalar_lea.vmem %s898_s10, %s1080_s15 [#allocation5]   ;;  %s918_s12 = scalar_lea.vmem %s900_s13, %s1080_s15  }
 0x1cb PF: > { %p1093_p13 = scmp.ge.s32.totalorder %s1320_s26, 2  ;;  %s930_s17 = sand.u32 1, %s1308_s23  }
 0x1cc   : > { %s931_s8 = scalar_lea.sflag [#allocation4], %s930_s17 }
 0x1cd   : > { %p1090_p0 = pnand %p1093_p13, %p1440_p6 }
 0x1cf   : > { %1303 = dma.done.wait (!%p1090_p0), %s931_s8, 32  }
 0x1d0   : > { %1305 = vsyncadd (!%p1090_p0), %s931_s8, 4294967264  ;;  %p18_p1 = scmp.ge.s32.totalorder %s1423_s28, 4   ;;  %s1800_s23 = smov %s1312_s24 }
 0x1d1   : > { %s1801_s24 = smov %s1316_s25  ;;  %s1802_s25 = smov %s1434_s7 }
 0x1d2   : > { %s1803_s26 = smov %s1423_s28  ;;  %20 = sbr.rel (!%p18_p1) target bundleno = 5 (0x5), region = 170 }
 0x1d9   :  { %943 = vsyncpa [#allocation4], 1 }
 0x1da   :  { %945 = vsyncpa [#allocation4 + $0x1], 1 }

</bundles_post_ra>
